<compile_context>
chip_gen: v5e
topology: v5e:2x2
jax: 0.10.0
libtpu: 0.0.40
codegen_flags: <defaults>
</compile_context>

<pallas_src>
import numpy as np
import jax
import jax.numpy as jnp
from jax.experimental import pallas as pl
from jax.experimental.pallas import tpu as pltpu


def _round_up(x, m):
    return (x + m - 1) // m * m


def _bf16_round(x):
    """Round a numpy f32 array through bf16 (to match the kernel's MXU operands)."""
    return np.asarray(jnp.asarray(x, jnp.float32).astype(jnp.bfloat16).astype(jnp.float32))


# ----------------------------- Pallas kernel -------------------------------- #
def _make_reconv_kernel(offsets, tl):
    """Fused-im2col conv kernel for one batch image (grid axis = batch).

    w_ref: (KK, OCp, Cp) bf16  per-tap dense weights, resident in VMEM
    b_ref: (OCp, 1)      f32   dense bias (0 on channels without bias), resident
    x_ref: (1, Cp, Lpad) bf16  flattened zero-padded image of batch b
    o_ref: (1, OCp, TL)  f32   stride-1 conv outputs over the padded plane
    """
    def kernel(w_ref, b_ref, x_ref, o_ref):
        acc = None
        for kk, off in enumerate(offsets):         # static unroll over K*K taps
            xs = x_ref[0, :, off:off + tl]         # (Cp, TL) bf16 lane window
            part = jnp.dot(w_ref[kk], xs, preferred_element_type=jnp.float32)
            acc = part if acc is None else acc + part
        o_ref[0] = acc + b_ref[...]                # bias added in f32
    return kernel


def reconv_forward(images, weight_dense, bias_dense, kernel_size, stride,
                   padding, H_out, W_out):
    """Forward pass matching ReConv_torch1.

    images:       (B, C, H, W) float32 NCHW
    weight_dense: (OC, C*K*K)  float32 densified sparse weights
    bias_dense:   (OC,)        float32 (0 on channels without bias)
    returns       (B, OC, H_out, W_out) float32
    """
    B, C, H, W = images.shape
    OC, CKK = weight_dense.shape
    K = kernel_size
    KK = K * K
    assert CKK == C * KK
    Hp, Wp = H + 2 * padding, W + 2 * padding

    # bf16 image as early as possible (halves every wrapper / DMA pass).
    x = images.astype(jnp.bfloat16)
    if padding:
        x = jnp.pad(x, ((0, 0), (0, 0), (padding, padding), (padding, padding)))

    # --- TPU-friendly padded sizes ------------------------------------------ #
    OCp = _round_up(OC, 16)                 # bf16 operand sublanes / f32 out rows
    Cp = _round_up(C, 8)                    # contraction dim / image sublanes
    Hspan = (H_out - 1) * stride + 1        # rows of the dense stride-1 plane
    Wspan = (W_out - 1) * stride + 1
    TL = _round_up(Hspan * Wp, 128)         # lane-dense output width per batch
    maxoff = (K - 1) * Wp + (K - 1)         # largest static tap offset
    Lpad = _round_up(max(Hp * Wp, TL + maxoff), 128)

    # --- fused-im2col operands (image read once; no K^2 HBM inflation) ------- #
    x = jnp.pad(x, ((0, 0), (0, Cp - C), (0, 0), (0, 0)))
    x = x.reshape(B, Cp, Hp * Wp)
    x = jnp.pad(x, ((0, 0), (0, 0), (0, Lpad - Hp * Wp)))      # (B, Cp, Lpad)

    w4 = weight_dense.reshape(OC, C, K, K)
    w_taps = jnp.transpose(w4, (2, 3, 0, 1)).reshape(KK, OC, C)   # [r*K+s, oc, c]
    w_taps = jnp.pad(w_taps, ((0, 0), (0, OCp - OC), (0, Cp - C)))
    w_taps = w_taps.astype(jnp.bfloat16)

    b_col = jnp.pad(bias_dense, (0, OCp - OC)).reshape(OCp, 1).astype(jnp.float32)

    offsets = [r * Wp + s for r in range(K) for s in range(K)]
    kernel = _make_reconv_kernel(offsets, TL)

    # --- VMEM budget; cap from the part's real capacity (v7x: 64 MiB/TC) ----- #
    need = (2 * Cp * Lpad * 2           # double-buffered bf16 image blocks
            + 2 * OCp * TL * 4          # double-buffered f32 output blocks
            + 2 * KK * OCp * Cp * 2     # weights (worst case: double-buffered)
            + 2 * OCp * 4)              # bias
    try:
        cap = int(pltpu.get_tpu_info().vmem_capacity_bytes)
    except Exception:
        cap = 128 << 20
    vmem_limit = int(min(max(2 * need, 4 << 20), min(96 << 20, cap // 2)))

    cparams = pltpu.CompilerParams(dimension_semantics=("parallel",),
                                   vmem_limit_bytes=vmem_limit)
    out_shape = jax.ShapeDtypeStruct((B, OCp, TL), jnp.float32)

    # grid=(B,): B=2 splits evenly over v7x's 2 TensorCores.  If B were 1 (or
    # odd on v7x) a second "parallel" axis over position tiles would be added.
    out = None
    last_err = None
    for single_buffer_resident in (True, False):
        try:
            resident_kw = (dict(pipeline_mode=pl.Buffered(1))
                           if single_buffer_resident else {})
            in_specs = [
                pl.BlockSpec((KK, OCp, Cp), lambda b: (0, 0, 0), **resident_kw),
                pl.BlockSpec((OCp, 1), lambda b: (0, 0), **resident_kw),
                pl.BlockSpec((1, Cp, Lpad), lambda b: (b, 0, 0)),
            ]
            out_specs = pl.BlockSpec((1, OCp, TL), lambda b: (b, 0, 0))
            out = pl.pallas_call(kernel, out_shape=out_shape, grid=(B,),
                                 in_specs=in_specs, out_specs=out_specs,
                                 compiler_params=cparams)(w_taps, b_col, x)
            out = jax.block_until_ready(out)
            break
        except Exception as err:    # fall back to default double-buffering
            last_err = err
            out = None
    if out is None:
        raise last_err

    # NCHW extraction: drop OC padding, keep valid rows/cols of the dense plane
    # (stride subsampling happens here; stride=1 is a plain slice).
    out = out[:, :OC, :Hspan * Wp].reshape(B, OC, Hspan, Wp)
    out = out[:, :, ::stride, :Wspan:stride]
    return out


# ----------------------- glue: densify the sparse weights ------------------- #
def densify(weight_state, bias_state, in_c, out_c, K):
    weight_index, weight_value, filter_lengths, start_points = weight_state
    bias_index, bias_value = bias_state
    # The decimal (c, r, s) encoding in ReConv_torch1 assumes C < 10 and K < 10.
    assert in_c < 10 and K < 10, "decimal weight_index encoding needs C<10, K<10"
    W4 = np.zeros((out_c, in_c, K, K), np.float32)
    for oc in range(out_c):
        for j in range(int(filter_lengths[oc])):
            loc = int(start_points[oc]) + j
            idx = int(weight_index[loc])
            c, r, s = idx // 100, (idx // 10) % 10, idx % 10
            W4[oc, c, r, s] = weight_value[loc]
    bias_dense = np.zeros((out_c,), np.float32)
    bias_dense[bias_index] = bias_value
    return W4.reshape(out_c, in_c * K * K), bias_dense


# --------------------- numpy emulation of the CUDA kernel ------------------- #
def cuda_reference(images_np, weight_state, bias_state, in_c, out_c, K, stride,
                   row, col, padding, B):
    """Faithful numpy emulation of ReConv_torch1.__init__ + convolution_with_bias1.

    NOTE: like the original module, this builds h_range from W_out and labels the
    output (B, OC, W_out, H_out); the test uses square spatial so this coincides
    with the standard NCHW conv output of the Pallas path.
    """
    weight_index, weight_value, filter_lengths, start_points = weight_state
    bias_index, bias_value = bias_state

    H_out = (row - K + 2 * padding) // stride + 1
    W_out = (col - K + 2 * padding) // stride + 1
    image_size = H_out * W_out
    rowp, colp = row + 2 * padding, col + 2 * padding
    plane = rowp * colp

    image_weight_index = (weight_index // 100) * plane \
        + (weight_index // 10 % 10) * colp + weight_index % 10

    total = len(weight_value) + len(bias_index)
    temp_index = np.zeros(total, np.int64)
    temp_value = np.zeros(total, np.float32)
    temp_start = np.zeros(out_c, np.int64)
    temp_len = np.zeros(out_c, np.int64)
    nsp = 0
    for i in range(out_c):
        L, sp = int(filter_lengths[i]), int(start_points[i])
        temp_start[i] = nsp
        temp_value[nsp:nsp + L] = weight_value[sp:sp + L]
        temp_index[nsp:nsp + L] = image_weight_index[sp:sp + L]
        if i in bias_index:
            temp_value[nsp + L] = bias_value[np.where(bias_index == i)[0][0]]
            temp_index[nsp + L] = 0
            nsp += L + 1
            temp_len[i] = -L
        else:
            nsp += L
            temp_len[i] = L

    if padding:
        images_np = np.pad(images_np, ((0, 0), (0, 0), (padding, padding),
                                       (padding, padding)))
    img_flat = images_np.reshape(B, -1)

    w_range = np.arange(0, stride * W_out, stride, dtype=np.int64)[None, :]
    h_range = np.arange(0, stride * W_out, stride, dtype=np.int64)[:, None] * colp
    image_range = (w_range + h_range).reshape(-1)

    out = np.zeros((B, out_c * image_size), np.float32)
    for oc in range(out_c):
        sp = temp_start[oc]
        L = temp_len[oc]
        n = -L if L < 0 else L
        for pos in range(image_size):
            off = image_range[pos]
            for b in range(B):
                acc = 0.0
                for i in range(n):
                    loc = sp + i
                    acc += img_flat[b, temp_index[loc] + off] * temp_value[loc]
                if L < 0:
                    acc += temp_value[sp + n]
                out[b, oc * image_size + pos] = acc
    return out.reshape(B, out_c, W_out, H_out)


# ------------------------------- main --------------------------------------- #
if __name__ == "__main__":
    B, C, OC, K = 2, 4, 8, 3
    ROW = COL = 16
    STRIDE, PADDING = 1, 0
    H_out = (ROW - K + 2 * PADDING) // STRIDE + 1
    W_out = (COL - K + 2 * PADDING) // STRIDE + 1

    key = jax.random.PRNGKey(0)
    k_img, k_w, k_b = jax.random.split(key, 3)

    # Deterministic sparse weight spec (same format as weight_state_dict):
    # keep entry (oc, c, r, s) iff (oc + c + r + s) is even.
    widx, lengths, starts = [], [], []
    for oc in range(OC):
        starts.append(len(widx))
        cnt = 0
        for c in range(C):
            for r in range(K):
                for s in range(K):
                    if (oc + c + r + s) % 2 == 0:
                        widx.append(c * 100 + r * 10 + s)
                        cnt += 1
        lengths.append(cnt)
    weight_index = np.array(widx, dtype=np.int64)
    filter_lengths = np.array(lengths, dtype=np.int64)
    start_points = np.array(starts, dtype=np.int64)
    weight_value = np.asarray(
        jax.random.normal(k_w, (len(weight_index),), dtype=jnp.float32))
    bias_index = np.array([1, 3, 6], dtype=np.int64)
    bias_value = np.asarray(
        jax.random.normal(k_b, (len(bias_index),), dtype=jnp.float32))

    # Densify for the Pallas path (glue).
    W_dense, bias_dense = densify(
        (weight_index, weight_value, filter_lengths, start_points),
        (bias_index, bias_value), C, OC, K)

    images = jax.random.normal(k_img, (B, C, ROW, COL), dtype=jnp.float32)

    out = reconv_forward(images, jnp.asarray(W_dense), jnp.asarray(bias_dense),
                         K, STRIDE, PADDING, H_out, W_out)
    out = jax.block_until_ready(out)

    # Reference with bf16-rounded operands to match the kernel's MXU path
    # (bias stays f32, same as the kernel).
    imgs_bf = _bf16_round(np.asarray(images))
    wval_bf = _bf16_round(weight_value)
    ref = cuda_reference(imgs_bf,
                         (weight_index, wval_bf, filter_lengths, start_points),
                         (bias_index, bias_value),
                         C, OC, K, STRIDE, ROW, COL, PADDING, B)

    np.testing.assert_allclose(np.asarray(out), ref, rtol=1e-3, atol=1e-3)
    print("KERNEL_OK")
</pallas_src>

<mosaic_0001>
module attributes {stable_mosaic.version = 11 : i64} {
  func.func @kernel(%arg0: i32, %arg1: memref<9x16x8xbf16, #tpu.memory_space<vmem>>, %arg2: memref<16x1xf32, #tpu.memory_space<vmem>>, %arg3: memref<1x8x384xbf16, #tpu.memory_space<vmem>>, %arg4: memref<1x16x256xf32, #tpu.memory_space<vmem>>) attributes {dimension_semantics = [#tpu.dimension_semantics<parallel>], iteration_bounds = array<i64: 2>, scalar_prefetch = 0 : i64, scratch_operands = 0 : i64, tpu.core_type = #tpu.core_type<tc>, window_params = [{pipeline_mode = #tpu.pipeline_mode<synchronous>, transform_indices = @transform_0, window_bounds = array<i64: 9, 16, 8>}, {pipeline_mode = #tpu.pipeline_mode<synchronous>, transform_indices = @transform_1, window_bounds = array<i64: 16, 1>}, {transform_indices = @transform_2, window_bounds = array<i64: 1, 8, 384>}, {transform_indices = @transform_3, window_bounds = array<i64: 1, 16, 256>}]} {
    %c0 = arith.constant 0 : index
    %c0_0 = arith.constant 0 : index
    %c0_1 = arith.constant 0 : index
    %0 = vector.load %arg3[%c0, %c0_0, %c0_1] : memref<1x8x384xbf16, #tpu.memory_space<vmem>>, vector<1x8x256xbf16>
    %1 = vector.shape_cast %0 : vector<1x8x256xbf16> to vector<8x256xbf16>
    %c0_2 = arith.constant 0 : index
    %c0_3 = arith.constant 0 : index
    %c0_4 = arith.constant 0 : index
    %2 = vector.load %arg1[%c0_2, %c0_3, %c0_4] : memref<9x16x8xbf16, #tpu.memory_space<vmem>>, vector<1x16x8xbf16>
    %3 = vector.shape_cast %2 : vector<1x16x8xbf16> to vector<16x8xbf16>
    %cst = arith.constant dense<0.000000e+00> : vector<16x256xf32>
    %4 = tpu.matmul %3, %1, %cst {dimension_numbers = #tpu.dot_dimension_numbers<[1], [0], [0], [1], [0, 0, 1, 1], [], []>} : vector<16x8xbf16>, vector<8x256xbf16>, vector<16x256xf32> -> vector<16x256xf32>
    %c0_5 = arith.constant 0 : index
    %c0_6 = arith.constant 0 : index
    %c1 = arith.constant 1 : index
    %5 = vector.load %arg3[%c0_5, %c0_6, %c1] : memref<1x8x384xbf16, #tpu.memory_space<vmem>>, vector<1x8x256xbf16>
    %6 = vector.shape_cast %5 : vector<1x8x256xbf16> to vector<8x256xbf16>
    %c1_7 = arith.constant 1 : index
    %c0_8 = arith.constant 0 : index
    %c0_9 = arith.constant 0 : index
    %7 = vector.load %arg1[%c1_7, %c0_8, %c0_9] : memref<9x16x8xbf16, #tpu.memory_space<vmem>>, vector<1x16x8xbf16>
    %8 = vector.shape_cast %7 : vector<1x16x8xbf16> to vector<16x8xbf16>
    %cst_10 = arith.constant dense<0.000000e+00> : vector<16x256xf32>
    %9 = tpu.matmul %8, %6, %cst_10 {dimension_numbers = #tpu.dot_dimension_numbers<[1], [0], [0], [1], [0, 0, 1, 1], [], []>} : vector<16x8xbf16>, vector<8x256xbf16>, vector<16x256xf32> -> vector<16x256xf32>
    %10 = arith.addf %4, %9 : vector<16x256xf32>
    %c0_11 = arith.constant 0 : index
    %c0_12 = arith.constant 0 : index
    %c2 = arith.constant 2 : index
    %11 = vector.load %arg3[%c0_11, %c0_12, %c2] : memref<1x8x384xbf16, #tpu.memory_space<vmem>>, vector<1x8x256xbf16>
    %12 = vector.shape_cast %11 : vector<1x8x256xbf16> to vector<8x256xbf16>
    %c2_13 = arith.constant 2 : index
    %c0_14 = arith.constant 0 : index
    %c0_15 = arith.constant 0 : index
    %13 = vector.load %arg1[%c2_13, %c0_14, %c0_15] : memref<9x16x8xbf16, #tpu.memory_space<vmem>>, vector<1x16x8xbf16>
    %14 = vector.shape_cast %13 : vector<1x16x8xbf16> to vector<16x8xbf16>
    %cst_16 = arith.constant dense<0.000000e+00> : vector<16x256xf32>
    %15 = tpu.matmul %14, %12, %cst_16 {dimension_numbers = #tpu.dot_dimension_numbers<[1], [0], [0], [1], [0, 0, 1, 1], [], []>} : vector<16x8xbf16>, vector<8x256xbf16>, vector<16x256xf32> -> vector<16x256xf32>
    %16 = arith.addf %10, %15 : vector<16x256xf32>
    %c0_17 = arith.constant 0 : index
    %c0_18 = arith.constant 0 : index
    %c16 = arith.constant 16 : index
    %17 = vector.load %arg3[%c0_17, %c0_18, %c16] : memref<1x8x384xbf16, #tpu.memory_space<vmem>>, vector<1x8x256xbf16>
    %18 = vector.shape_cast %17 : vector<1x8x256xbf16> to vector<8x256xbf16>
    %c3 = arith.constant 3 : index
    %c0_19 = arith.constant 0 : index
    %c0_20 = arith.constant 0 : index
    %19 = vector.load %arg1[%c3, %c0_19, %c0_20] : memref<9x16x8xbf16, #tpu.memory_space<vmem>>, vector<1x16x8xbf16>
    %20 = vector.shape_cast %19 : vector<1x16x8xbf16> to vector<16x8xbf16>
    %cst_21 = arith.constant dense<0.000000e+00> : vector<16x256xf32>
    %21 = tpu.matmul %20, %18, %cst_21 {dimension_numbers = #tpu.dot_dimension_numbers<[1], [0], [0], [1], [0, 0, 1, 1], [], []>} : vector<16x8xbf16>, vector<8x256xbf16>, vector<16x256xf32> -> vector<16x256xf32>
    %22 = arith.addf %16, %21 : vector<16x256xf32>
    %c0_22 = arith.constant 0 : index
    %c0_23 = arith.constant 0 : index
    %c17 = arith.constant 17 : index
    %23 = vector.load %arg3[%c0_22, %c0_23, %c17] : memref<1x8x384xbf16, #tpu.memory_space<vmem>>, vector<1x8x256xbf16>
    %24 = vector.shape_cast %23 : vector<1x8x256xbf16> to vector<8x256xbf16>
    %c4 = arith.constant 4 : index
    %c0_24 = arith.constant 0 : index
    %c0_25 = arith.constant 0 : index
    %25 = vector.load %arg1[%c4, %c0_24, %c0_25] : memref<9x16x8xbf16, #tpu.memory_space<vmem>>, vector<1x16x8xbf16>
    %26 = vector.shape_cast %25 : vector<1x16x8xbf16> to vector<16x8xbf16>
    %cst_26 = arith.constant dense<0.000000e+00> : vector<16x256xf32>
    %27 = tpu.matmul %26, %24, %cst_26 {dimension_numbers = #tpu.dot_dimension_numbers<[1], [0], [0], [1], [0, 0, 1, 1], [], []>} : vector<16x8xbf16>, vector<8x256xbf16>, vector<16x256xf32> -> vector<16x256xf32>
    %28 = arith.addf %22, %27 : vector<16x256xf32>
    %c0_27 = arith.constant 0 : index
    %c0_28 = arith.constant 0 : index
    %c18 = arith.constant 18 : index
    %29 = vector.load %arg3[%c0_27, %c0_28, %c18] : memref<1x8x384xbf16, #tpu.memory_space<vmem>>, vector<1x8x256xbf16>
    %30 = vector.shape_cast %29 : vector<1x8x256xbf16> to vector<8x256xbf16>
    %c5 = arith.constant 5 : index
    %c0_29 = arith.constant 0 : index
    %c0_30 = arith.constant 0 : index
    %31 = vector.load %arg1[%c5, %c0_29, %c0_30] : memref<9x16x8xbf16, #tpu.memory_space<vmem>>, vector<1x16x8xbf16>
    %32 = vector.shape_cast %31 : vector<1x16x8xbf16> to vector<16x8xbf16>
    %cst_31 = arith.constant dense<0.000000e+00> : vector<16x256xf32>
    %33 = tpu.matmul %32, %30, %cst_31 {dimension_numbers = #tpu.dot_dimension_numbers<[1], [0], [0], [1], [0, 0, 1, 1], [], []>} : vector<16x8xbf16>, vector<8x256xbf16>, vector<16x256xf32> -> vector<16x256xf32>
    %34 = arith.addf %28, %33 : vector<16x256xf32>
    %c0_32 = arith.constant 0 : index
    %c0_33 = arith.constant 0 : index
    %c32 = arith.constant 32 : index
    %35 = vector.load %arg3[%c0_32, %c0_33, %c32] : memref<1x8x384xbf16, #tpu.memory_space<vmem>>, vector<1x8x256xbf16>
    %36 = vector.shape_cast %35 : vector<1x8x256xbf16> to vector<8x256xbf16>
    %c6 = arith.constant 6 : index
    %c0_34 = arith.constant 0 : index
    %c0_35 = arith.constant 0 : index
    %37 = vector.load %arg1[%c6, %c0_34, %c0_35] : memref<9x16x8xbf16, #tpu.memory_space<vmem>>, vector<1x16x8xbf16>
    %38 = vector.shape_cast %37 : vector<1x16x8xbf16> to vector<16x8xbf16>
    %cst_36 = arith.constant dense<0.000000e+00> : vector<16x256xf32>
    %39 = tpu.matmul %38, %36, %cst_36 {dimension_numbers = #tpu.dot_dimension_numbers<[1], [0], [0], [1], [0, 0, 1, 1], [], []>} : vector<16x8xbf16>, vector<8x256xbf16>, vector<16x256xf32> -> vector<16x256xf32>
    %40 = arith.addf %34, %39 : vector<16x256xf32>
    %c0_37 = arith.constant 0 : index
    %c0_38 = arith.constant 0 : index
    %c33 = arith.constant 33 : index
    %41 = vector.load %arg3[%c0_37, %c0_38, %c33] : memref<1x8x384xbf16, #tpu.memory_space<vmem>>, vector<1x8x256xbf16>
    %42 = vector.shape_cast %41 : vector<1x8x256xbf16> to vector<8x256xbf16>
    %c7 = arith.constant 7 : index
    %c0_39 = arith.constant 0 : index
    %c0_40 = arith.constant 0 : index
    %43 = vector.load %arg1[%c7, %c0_39, %c0_40] : memref<9x16x8xbf16, #tpu.memory_space<vmem>>, vector<1x16x8xbf16>
    %44 = vector.shape_cast %43 : vector<1x16x8xbf16> to vector<16x8xbf16>
    %cst_41 = arith.constant dense<0.000000e+00> : vector<16x256xf32>
    %45 = tpu.matmul %44, %42, %cst_41 {dimension_numbers = #tpu.dot_dimension_numbers<[1], [0], [0], [1], [0, 0, 1, 1], [], []>} : vector<16x8xbf16>, vector<8x256xbf16>, vector<16x256xf32> -> vector<16x256xf32>
    %46 = arith.addf %40, %45 : vector<16x256xf32>
    %c0_42 = arith.constant 0 : index
    %c0_43 = arith.constant 0 : index
    %c34 = arith.constant 34 : index
    %47 = vector.load %arg3[%c0_42, %c0_43, %c34] : memref<1x8x384xbf16, #tpu.memory_space<vmem>>, vector<1x8x256xbf16>
    %48 = vector.shape_cast %47 : vector<1x8x256xbf16> to vector<8x256xbf16>
    %c8 = arith.constant 8 : index
    %c0_44 = arith.constant 0 : index
    %c0_45 = arith.constant 0 : index
    %49 = vector.load %arg1[%c8, %c0_44, %c0_45] : memref<9x16x8xbf16, #tpu.memory_space<vmem>>, vector<1x16x8xbf16>
    %50 = vector.shape_cast %49 : vector<1x16x8xbf16> to vector<16x8xbf16>
    %cst_46 = arith.constant dense<0.000000e+00> : vector<16x256xf32>
    %51 = tpu.matmul %50, %48, %cst_46 {dimension_numbers = #tpu.dot_dimension_numbers<[1], [0], [0], [1], [0, 0, 1, 1], [], []>} : vector<16x8xbf16>, vector<8x256xbf16>, vector<16x256xf32> -> vector<16x256xf32>
    %52 = arith.addf %46, %51 : vector<16x256xf32>
    %c0_47 = arith.constant 0 : index
    %c0_48 = arith.constant 0 : index
    %53 = vector.load %arg2[%c0_47, %c0_48] : memref<16x1xf32, #tpu.memory_space<vmem>>, vector<16x1xf32>
    %54 = vector.broadcast %53 : vector<16x1xf32> to vector<16x256xf32>
    %55 = arith.addf %52, %54 : vector<16x256xf32>
    %c0_49 = arith.constant 0 : index
    %c0_50 = arith.constant 0 : index
    %c0_51 = arith.constant 0 : index
    %56 = vector.load %arg4[%c0_49, %c0_50, %c0_51] : memref<1x16x256xf32, #tpu.memory_space<vmem>>, vector<1x16x256xf32>
    %57 = vector.shape_cast %56 : vector<1x16x256xf32> to vector<16x256xf32>
    %58 = vector.shape_cast %55 : vector<16x256xf32> to vector<1x16x256xf32>
    tpu.vector_store %arg4[%c0_49, %c0_50, %c0_51], %58 {strides = array<i32>} : memref<1x16x256xf32, #tpu.memory_space<vmem>>, vector<1x16x256xf32>,
    return
  }
  func.func @transform_0(%arg0: i32) -> (i32, i32, i32) {
    %c0_i32 = arith.constant 0 : i32
    %c0_i32_0 = arith.constant 0 : i32
    %c0_i32_1 = arith.constant 0 : i32
    %c0_i32_2 = arith.constant 0 : i32
    return %c0_i32, %c0_i32_0, %c0_i32_1 : i32, i32, i32
  }
  func.func @transform_1(%arg0: i32) -> (i32, i32) {
    %c0_i32 = arith.constant 0 : i32
    %c0_i32_0 = arith.constant 0 : i32
    %c0_i32_1 = arith.constant 0 : i32
    return %c0_i32, %c0_i32_0 : i32, i32
  }
  func.func @transform_2(%arg0: i32) -> (i32, i32, i32) {
    %c0_i32 = arith.constant 0 : i32
    %c0_i32_0 = arith.constant 0 : i32
    %c0_i32_1 = arith.constant 0 : i32
    return %arg0, %c0_i32, %c0_i32_0 : i32, i32, i32
  }
  func.func @transform_3(%arg0: i32) -> (i32, i32, i32) {
    %c0_i32 = arith.constant 0 : i32
    %c0_i32_0 = arith.constant 0 : i32
    %c0_i32_1 = arith.constant 0 : i32
    return %arg0, %c0_i32, %c0_i32_0 : i32, i32, i32
  }
}

module attributes {stable_mosaic.version = 11 : i64} {
  func.func @kernel(%arg0: i32, %arg1: memref<9x16x8xbf16, #tpu.memory_space<vmem>>, %arg2: memref<16x1xf32, #tpu.memory_space<vmem>>, %arg3: memref<1x8x384xbf16, #tpu.memory_space<vmem>>, %arg4: memref<1x16x256xf32, #tpu.memory_space<vmem>>) attributes {dimension_semantics = [#tpu.dimension_semantics<parallel>], iteration_bounds = array<i64: 2>, scalar_prefetch = 0 : i64, scratch_operands = 0 : i64, tpu.core_type = #tpu.core_type<tc>, window_params = [{pipeline_mode = #tpu.pipeline_mode<synchronous>, transform_indices = @transform_0, window_bounds = array<i64: 9, 16, 8>}, {pipeline_mode = #tpu.pipeline_mode<synchronous>, transform_indices = @transform_1, window_bounds = array<i64: 16, 1>}, {transform_indices = @transform_2, window_bounds = array<i64: 1, 8, 384>}, {transform_indices = @transform_3, window_bounds = array<i64: 1, 16, 256>}]} {
    %c0 = arith.constant 0 : index
    %c0_0 = arith.constant 0 : index
    %c0_1 = arith.constant 0 : index
    %0 = vector.load %arg3[%c0, %c0_0, %c0_1] : memref<1x8x384xbf16, #tpu.memory_space<vmem>>, vector<1x8x256xbf16>
    %1 = vector.shape_cast %0 : vector<1x8x256xbf16> to vector<8x256xbf16>
    %c0_2 = arith.constant 0 : index
    %c0_3 = arith.constant 0 : index
    %c0_4 = arith.constant 0 : index
    %2 = vector.load %arg1[%c0_2, %c0_3, %c0_4] : memref<9x16x8xbf16, #tpu.memory_space<vmem>>, vector<1x16x8xbf16>
    %3 = vector.shape_cast %2 : vector<1x16x8xbf16> to vector<16x8xbf16>
    %cst = arith.constant dense<0.000000e+00> : vector<16x256xf32>
    %4 = tpu.matmul %3, %1, %cst {dimension_numbers = #tpu.dot_dimension_numbers<[1], [0], [0], [1], [0, 0, 1, 1], [], []>} : vector<16x8xbf16>, vector<8x256xbf16>, vector<16x256xf32> -> vector<16x256xf32>
    %c0_5 = arith.constant 0 : index
    %c0_6 = arith.constant 0 : index
    %c1 = arith.constant 1 : index
    %5 = vector.load %arg3[%c0_5, %c0_6, %c1] : memref<1x8x384xbf16, #tpu.memory_space<vmem>>, vector<1x8x256xbf16>
    %6 = vector.shape_cast %5 : vector<1x8x256xbf16> to vector<8x256xbf16>
    %c1_7 = arith.constant 1 : index
    %c0_8 = arith.constant 0 : index
    %c0_9 = arith.constant 0 : index
    %7 = vector.load %arg1[%c1_7, %c0_8, %c0_9] : memref<9x16x8xbf16, #tpu.memory_space<vmem>>, vector<1x16x8xbf16>
    %8 = vector.shape_cast %7 : vector<1x16x8xbf16> to vector<16x8xbf16>
    %cst_10 = arith.constant dense<0.000000e+00> : vector<16x256xf32>
    %9 = tpu.matmul %8, %6, %cst_10 {dimension_numbers = #tpu.dot_dimension_numbers<[1], [0], [0], [1], [0, 0, 1, 1], [], []>} : vector<16x8xbf16>, vector<8x256xbf16>, vector<16x256xf32> -> vector<16x256xf32>
    %10 = arith.addf %4, %9 : vector<16x256xf32>
    %c0_11 = arith.constant 0 : index
    %c0_12 = arith.constant 0 : index
    %c2 = arith.constant 2 : index
    %11 = vector.load %arg3[%c0_11, %c0_12, %c2] : memref<1x8x384xbf16, #tpu.memory_space<vmem>>, vector<1x8x256xbf16>
    %12 = vector.shape_cast %11 : vector<1x8x256xbf16> to vector<8x256xbf16>
    %c2_13 = arith.constant 2 : index
    %c0_14 = arith.constant 0 : index
    %c0_15 = arith.constant 0 : index
    %13 = vector.load %arg1[%c2_13, %c0_14, %c0_15] : memref<9x16x8xbf16, #tpu.memory_space<vmem>>, vector<1x16x8xbf16>
    %14 = vector.shape_cast %13 : vector<1x16x8xbf16> to vector<16x8xbf16>
    %cst_16 = arith.constant dense<0.000000e+00> : vector<16x256xf32>
    %15 = tpu.matmul %14, %12, %cst_16 {dimension_numbers = #tpu.dot_dimension_numbers<[1], [0], [0], [1], [0, 0, 1, 1], [], []>} : vector<16x8xbf16>, vector<8x256xbf16>, vector<16x256xf32> -> vector<16x256xf32>
    %16 = arith.addf %10, %15 : vector<16x256xf32>
    %c0_17 = arith.constant 0 : index
    %c0_18 = arith.constant 0 : index
    %c16 = arith.constant 16 : index
    %17 = vector.load %arg3[%c0_17, %c0_18, %c16] : memref<1x8x384xbf16, #tpu.memory_space<vmem>>, vector<1x8x256xbf16>
    %18 = vector.shape_cast %17 : vector<1x8x256xbf16> to vector<8x256xbf16>
    %c3 = arith.constant 3 : index
    %c0_19 = arith.constant 0 : index
    %c0_20 = arith.constant 0 : index
    %19 = vector.load %arg1[%c3, %c0_19, %c0_20] : memref<9x16x8xbf16, #tpu.memory_space<vmem>>, vector<1x16x8xbf16>
    %20 = vector.shape_cast %19 : vector<1x16x8xbf16> to vector<16x8xbf16>
    %cst_21 = arith.constant dense<0.000000e+00> : vector<16x256xf32>
    %21 = tpu.matmul %20, %18, %cst_21 {dimension_numbers = #tpu.dot_dimension_numbers<[1], [0], [0], [1], [0, 0, 1, 1], [], []>} : vector<16x8xbf16>, vector<8x256xbf16>, vector<16x256xf32> -> vector<16x256xf32>
    %22 = arith.addf %16, %21 : vector<16x256xf32>
    %c0_22 = arith.constant 0 : index
    %c0_23 = arith.constant 0 : index
    %c17 = arith.constant 17 : index
    %23 = vector.load %arg3[%c0_22, %c0_23, %c17] : memref<1x8x384xbf16, #tpu.memory_space<vmem>>, vector<1x8x256xbf16>
    %24 = vector.shape_cast %23 : vector<1x8x256xbf16> to vector<8x256xbf16>
    %c4 = arith.constant 4 : index
    %c0_24 = arith.constant 0 : index
    %c0_25 = arith.constant 0 : index
    %25 = vector.load %arg1[%c4, %c0_24, %c0_25] : memref<9x16x8xbf16, #tpu.memory_space<vmem>>, vector<1x16x8xbf16>
    %26 = vector.shape_cast %25 : vector<1x16x8xbf16> to vector<16x8xbf16>
    %cst_26 = arith.constant dense<0.000000e+00> : vector<16x256xf32>
    %27 = tpu.matmul %26, %24, %cst_26 {dimension_numbers = #tpu.dot_dimension_numbers<[1], [0], [0], [1], [0, 0, 1, 1], [], []>} : vector<16x8xbf16>, vector<8x256xbf16>, vector<16x256xf32> -> vector<16x256xf32>
    %28 = arith.addf %22, %27 : vector<16x256xf32>
    %c0_27 = arith.constant 0 : index
    %c0_28 = arith.constant 0 : index
    %c18 = arith.constant 18 : index
    %29 = vector.load %arg3[%c0_27, %c0_28, %c18] : memref<1x8x384xbf16, #tpu.memory_space<vmem>>, vector<1x8x256xbf16>
    %30 = vector.shape_cast %29 : vector<1x8x256xbf16> to vector<8x256xbf16>
    %c5 = arith.constant 5 : index
    %c0_29 = arith.constant 0 : index
    %c0_30 = arith.constant 0 : index
    %31 = vector.load %arg1[%c5, %c0_29, %c0_30] : memref<9x16x8xbf16, #tpu.memory_space<vmem>>, vector<1x16x8xbf16>
    %32 = vector.shape_cast %31 : vector<1x16x8xbf16> to vector<16x8xbf16>
    %cst_31 = arith.constant dense<0.000000e+00> : vector<16x256xf32>
    %33 = tpu.matmul %32, %30, %cst_31 {dimension_numbers = #tpu.dot_dimension_numbers<[1], [0], [0], [1], [0, 0, 1, 1], [], []>} : vector<16x8xbf16>, vector<8x256xbf16>, vector<16x256xf32> -> vector<16x256xf32>
    %34 = arith.addf %28, %33 : vector<16x256xf32>
    %c0_32 = arith.constant 0 : index
    %c0_33 = arith.constant 0 : index
    %c32 = arith.constant 32 : index
    %35 = vector.load %arg3[%c0_32, %c0_33, %c32] : memref<1x8x384xbf16, #tpu.memory_space<vmem>>, vector<1x8x256xbf16>
    %36 = vector.shape_cast %35 : vector<1x8x256xbf16> to vector<8x256xbf16>
    %c6 = arith.constant 6 : index
    %c0_34 = arith.constant 0 : index
    %c0_35 = arith.constant 0 : index
    %37 = vector.load %arg1[%c6, %c0_34, %c0_35] : memref<9x16x8xbf16, #tpu.memory_space<vmem>>, vector<1x16x8xbf16>
    %38 = vector.shape_cast %37 : vector<1x16x8xbf16> to vector<16x8xbf16>
    %cst_36 = arith.constant dense<0.000000e+00> : vector<16x256xf32>
    %39 = tpu.matmul %38, %36, %cst_36 {dimension_numbers = #tpu.dot_dimension_numbers<[1], [0], [0], [1], [0, 0, 1, 1], [], []>} : vector<16x8xbf16>, vector<8x256xbf16>, vector<16x256xf32> -> vector<16x256xf32>
    %40 = arith.addf %34, %39 : vector<16x256xf32>
    %c0_37 = arith.constant 0 : index
    %c0_38 = arith.constant 0 : index
    %c33 = arith.constant 33 : index
    %41 = vector.load %arg3[%c0_37, %c0_38, %c33] : memref<1x8x384xbf16, #tpu.memory_space<vmem>>, vector<1x8x256xbf16>
    %42 = vector.shape_cast %41 : vector<1x8x256xbf16> to vector<8x256xbf16>
    %c7 = arith.constant 7 : index
    %c0_39 = arith.constant 0 : index
    %c0_40 = arith.constant 0 : index
    %43 = vector.load %arg1[%c7, %c0_39, %c0_40] : memref<9x16x8xbf16, #tpu.memory_space<vmem>>, vector<1x16x8xbf16>
    %44 = vector.shape_cast %43 : vector<1x16x8xbf16> to vector<16x8xbf16>
    %cst_41 = arith.constant dense<0.000000e+00> : vector<16x256xf32>
    %45 = tpu.matmul %44, %42, %cst_41 {dimension_numbers = #tpu.dot_dimension_numbers<[1], [0], [0], [1], [0, 0, 1, 1], [], []>} : vector<16x8xbf16>, vector<8x256xbf16>, vector<16x256xf32> -> vector<16x256xf32>
    %46 = arith.addf %40, %45 : vector<16x256xf32>
    %c0_42 = arith.constant 0 : index
    %c0_43 = arith.constant 0 : index
    %c34 = arith.constant 34 : index
    %47 = vector.load %arg3[%c0_42, %c0_43, %c34] : memref<1x8x384xbf16, #tpu.memory_space<vmem>>, vector<1x8x256xbf16>
    %48 = vector.shape_cast %47 : vector<1x8x256xbf16> to vector<8x256xbf16>
    %c8 = arith.constant 8 : index
    %c0_44 = arith.constant 0 : index
    %c0_45 = arith.constant 0 : index
    %49 = vector.load %arg1[%c8, %c0_44, %c0_45] : memref<9x16x8xbf16, #tpu.memory_space<vmem>>, vector<1x16x8xbf16>
    %50 = vector.shape_cast %49 : vector<1x16x8xbf16> to vector<16x8xbf16>
    %cst_46 = arith.constant dense<0.000000e+00> : vector<16x256xf32>
    %51 = tpu.matmul %50, %48, %cst_46 {dimension_numbers = #tpu.dot_dimension_numbers<[1], [0], [0], [1], [0, 0, 1, 1], [], []>} : vector<16x8xbf16>, vector<8x256xbf16>, vector<16x256xf32> -> vector<16x256xf32>
    %52 = arith.addf %46, %51 : vector<16x256xf32>
    %c0_47 = arith.constant 0 : index
    %c0_48 = arith.constant 0 : index
    %53 = vector.load %arg2[%c0_47, %c0_48] : memref<16x1xf32, #tpu.memory_space<vmem>>, vector<16x1xf32>
    %54 = vector.broadcast %53 : vector<16x1xf32> to vector<16x256xf32>
    %55 = arith.addf %52, %54 : vector<16x256xf32>
    %c0_49 = arith.constant 0 : index
    %c0_50 = arith.constant 0 : index
    %c0_51 = arith.constant 0 : index
    %56 = vector.load %arg4[%c0_49, %c0_50, %c0_51] : memref<1x16x256xf32, #tpu.memory_space<vmem>>, vector<1x16x256xf32>
    %57 = vector.shape_cast %56 : vector<1x16x256xf32> to vector<16x256xf32>
    %58 = vector.shape_cast %55 : vector<16x256xf32> to vector<1x16x256xf32>
    tpu.vector_store %arg4[%c0_49, %c0_50, %c0_51], %58 {strides = array<i32>} : memref<1x16x256xf32, #tpu.memory_space<vmem>>, vector<1x16x256xf32>,
    return
  }
  func.func @transform_0(%arg0: i32) -> (i32, i32, i32) {
    %c0_i32 = arith.constant 0 : i32
    %c0_i32_0 = arith.constant 0 : i32
    %c0_i32_1 = arith.constant 0 : i32
    %c0_i32_2 = arith.constant 0 : i32
    return %c0_i32, %c0_i32_0, %c0_i32_1 : i32, i32, i32
  }
  func.func @transform_1(%arg0: i32) -> (i32, i32) {
    %c0_i32 = arith.constant 0 : i32
    %c0_i32_0 = arith.constant 0 : i32
    %c0_i32_1 = arith.constant 0 : i32
    return %c0_i32, %c0_i32_0 : i32, i32
  }
  func.func @transform_2(%arg0: i32) -> (i32, i32, i32) {
    %c0_i32 = arith.constant 0 : i32
    %c0_i32_0 = arith.constant 0 : i32
    %c0_i32_1 = arith.constant 0 : i32
    return %arg0, %c0_i32, %c0_i32_0 : i32, i32, i32
  }
  func.func @transform_3(%arg0: i32) -> (i32, i32, i32) {
    %c0_i32 = arith.constant 0 : i32
    %c0_i32_0 = arith.constant 0 : i32
    %c0_i32_1 = arith.constant 0 : i32
    return %arg0, %c0_i32, %c0_i32_0 : i32, i32, i32
  }
}

</mosaic_0001>

<bundles_post_ra>
// kernel: tpu_custom_call.1
= control target key start
LH: loop header
LB: loop body
LE: loop exit
PB: predicated region body
PF: predicated region fallthrough
CT: control target
= control target key end

     0   :  { %8 = vsyncpa [#allocation3], 0  ;;  %s1187_s0 = inlined_call_operand.vmem [shape: bf16[9,16,8], index: 0, kind: input, shape index: {}]   ;;  %s1188_s1 = inlined_call_operand.vmem [shape: f32[16,1], index: 1, kind: input, shape index: {}]   ;;  %s1189_s2 = inlined_call_operand.vmem [shape: bf16[2,8,384], index: 2, kind: input, shape index: {}]   ;;  %s1190_s3 = inlined_call_operand.hbm [shape: f32[2,16,256], index: 3, kind: output, shape index: {}]  }
   0x1   :  { %10 = vsyncpa [#allocation3 + $0x1], 0  ;;  %s1029_s12 = smov 0   ;;  %s1031_s13 = smov 0  }
   0x2   :  { %s1033_s14 = smov 0   ;;  %s1035_s15 = smov 0  }
   0x3 LB: > { %s1050_s16 = sadd.s32 4294967295, %s996_s15   ;;  %s790_s17 = sadd.s32 4294967294, %s996_s15   ;;  %s996_s15 = sphi %s1035_s15, %s1196_s15   ;;  %s992_s14 = sphi %s1033_s14, %s1195_s14   ;;  %s988_s13 = sphi %s1031_s13, %s1194_s13   ;;  %s984_s12 = sphi %s1029_s12, %s1193_s12  }
   0x4   : > { %s1054_s18 = sadd.s32 1, %s996_s15   ;;  %s91_s19 = sadd.s32 1, %s992_s14 }
   0x5   : > { %s88_s20 = ssub.s32 %s996_s15, %s1054_s18  ;;  %p101_p0 = scmp.ne.s32.totalorder %s992_s14, %s988_s13 }
   0x6   : > { %p89_p1 = scmp.eq.s32.totalorder %s88_s20, 0  ;;  %p102_p2 = scmp.eq.s32.totalorder %s1050_s16, 1 }
   0x7   : > { %p107_p3 = scmp.ne.s32.totalorder %s988_s13, %s984_s12  ;;  %p108_p4 = scmp.eq.s32.totalorder %s790_s17, 1 }
   0x8   : > { %s1065_s21 = scalar_select %p89_p1, %s992_s14, %s91_s19  }
   0x9   : > { %p1067_p5 = por %p102_p2, %p101_p0  ;;  %p1071_p6 = por %p108_p4, %p107_p3 }
   0xa   : > { %p793_p7 = scmp.ge.s32.totalorder %s996_s15, 1  ;;  %p140_p8 = scmp.lt.s32.totalorder %s996_s15, 3 }
   0xc   : > { %p141_p9 = pnand %p793_p7, %p140_p8 }
   0xd   : > { %p164_p10 = scmp.lt.s32.totalorder (!%p141_p9), %s1050_s16, 1  ;;  %s998_s29 = smov (!%p141_p9), 127  }
   0xe   : > { %144 = sbr.rel (%p141_p9) target bundleno = 364 (0x16c), region = 32  ;;  %s999_s30 = smov (!%p141_p9), 126  }
   0xf   : > { %s1000_s4 = smov (!%p141_p9), 112   ;;  %s1001_s5 = smov (!%p141_p9), 111  }
  0x10   : > { %s1002_s6 = smov (!%p141_p9), 110   ;;  %s1003_s7 = smov (!%p141_p9), 96  }
  0x11   : > { %s1004_s8 = smov (!%p141_p9), 95   ;;  %s1005_s9 = smov (!%p141_p9), 94  }
  0x12   : > { %s161_s20 = sand.u32 (!%p141_p9), 1, %s988_s13  }
  0x13   : > { %s165_s24 = scalar_select %p164_p10, %s1050_s16, 1  ;;  %vm204_vm0 = vcmask 1043456   ;;  %v871_v10 = vld [vmem:[%s1187_s0] sm:$0xff]  ;;  %vm200_vm1 = vcmask 64512   ;;  %vm300_vm2 = vcmask 1031168   ;;  %vm197_vm3 = vcmask 1039360  }
  0x14   : > { %v872_v26 = vld [vmem:[%s1187_s0 + $0x8] sm:$0xff]  ;;  %vm358_vm4 = vcmask 916480   ;;  %v874_v34 = vld [vmem:[%s1187_s0 + $0x18] sm:$0xff]  ;;  %vm416_vm5 = vcmask 908288   ;;  %v873_v41 = vld [vmem:[%s1187_s0 + $0x10] sm:$0xff]  ;;  %vm474_vm6 = vcmask 900096  }
  0x15   : > { %s881_s25 = smul.u32 12, %s165_s24  ;;  %v876_v49 = vld [vmem:[%s1187_s0 + $0x28] sm:$0xff]  ;;  %vm532_vm7 = vcmask 785408   ;;  %v875_v57 = vld [vmem:[%s1187_s0 + $0x20] sm:$0xff]  ;;  %vm590_vm8 = vcmask 777216   ;;  %v1006_v61 = vmov 0  }
  0x16   : > { %v692_v59 = vld [vmem:[%s1188_s1] sm:$0xff]  ;;  %v693_v60 = vld [vmem:[%s1188_s1 + $0x8] sm:$0xff]  ;;  %932 = vset.pattern.permute.xlu0 %v1006_v61  ;;  %933 = vset.pattern.permute.xlu1 %v1006_v61  ;;  %vm648_vm9 = vcmask 769024   ;;  %s794_s24 = sshll.u32 %s161_s20, 5 }
  0x17   : > { %s168_s28 = scalar_lea.vmem %s1189_s2, %s881_s25  ;;  %s880_s25 = sshll.u32 %s1050_s16, 5 }
  0x18   : > { %v174_v0 = vld [vmem:[%s168_s28 + $0x8] sm:$0xf]  ;;  %v173_v1 = vld [vmem:[%s168_s28] sm:$0xff]  ;;  %s163_s26 = scalar_lea.vmem [#allocation2], %s794_s24 }
  0x19   : > { %v187_v2 = vunpack.c.l.b16 %v174_v0  ;;  %v185_v3 = vunpack.c.l.b16 %v173_v1  ;;  %v186_v4 = vunpack.c.h.b16 %v173_v1 }
  0x1b   : > { %v190_v5 = vpack.c.b16 %v187_v2, %v187_v2  ;;  %v188_v6 = vpack.c.b16 %v185_v3, %v185_v3  ;;  %v189_v7 = vpack.c.b16 %v186_v4, %v186_v4  ;;  %v878_v4 = vld [vmem:[%s1187_s0 + $0x38] sm:$0xff] }
  0x1d   : > { %195 = vrot.lane.b32.xlu1 %v190_v5, %s998_s29  ;;  %191 = vrot.lane.b32.xlu0 %v188_v6, %s998_s29  ;;  %v253_v8 = vsel %vm204_vm0, %v188_v6, 0  ;;  %v256_v9 = vsel %vm204_vm0, %v189_v7, 0 }
  0x1e   : > { %296 = vrot.lane.b32.xlu2 %v189_v7, %s999_s30  ;;  %265 = vmatpush.bf16.msra.mxu2 %v253_v8 }
  0x1f   : > { %279 = vmatpush.bf16.msra.mxu3 %v256_v9 }
  0x21   : > { %808 = vmatmul.msk.bf16.vlgmr.msra.gmra.mxu2 %vm200_vm1, %v871_v10 }
  0x22   : > { %809 = vmatmul.msk.bf16.vlgmr.msra.gmra.mxu3 %vm200_vm1, %v871_v10 }
  0x25   : > { %294 = vrot.lane.b32.xlu1 %v188_v6, %s999_s30  ;;  %193 = vrot.lane.b32.xlu0 %v189_v7, %s998_s29  ;;  %s724_s29 = scalar_lea.hbm %s1190_s3, %s880_s25 }
  0x26   : > { %298 = vrot.lane.b32.xlu2 %v190_v5, %s999_s30  ;;  %s725_s30 = sshll.u32 %s163_s26, 4  ;;  %s727_s16 = sshll.u32 %s724_s29, 4  ;;  %s726_s30 = int_to_ptr.vmem [resolvable:$true] %s725_s30  ;;  %s728_s16 = int_to_ptr.hbm [resolvable:$true] %s727_s16 }
  0x2d   : > { %354 = vrot.lane.b32.xlu1 %v189_v7, %s1000_s4  ;;  %352 = vrot.lane.b32.xlu0 %v188_v6, %s1000_s4 }
  0x2e   : > { %356 = vrot.lane.b32.xlu2 %v190_v5, %s1000_s4  ;;  %s713_s4 = scalar_lea.sflag [#allocation3], %s161_s20 }
  0x35   : > { %412 = vrot.lane.b32.xlu1 %v189_v7, %s1001_s5  ;;  %410 = vrot.lane.b32.xlu0 %v188_v6, %s1001_s5 }
  0x36   : > { %414 = vrot.lane.b32.xlu2 %v190_v5, %s1001_s5  ;;  %s948_s5 = sshra.s32 %s728_s16, 4  ;;  %s949_s5 = int_to_ptr.hbm [resolvable:$true] %s948_s5 }
  0x37   : > { %p955_p0 = scmp.lt.s32.totalorder %s949_s5, %s1190_s3 }
  0x3d   : > { %470 = vrot.lane.b32.xlu1 %v189_v7, %s1002_s6  ;;  %468 = vrot.lane.b32.xlu0 %v188_v6, %s1002_s6 }
  0x3e   : > { %472 = vrot.lane.b32.xlu2 %v190_v5, %s1002_s6  ;;  %s950_s6 = scalar_lea.hbm %s949_s5, 32 }
  0x3f   : > { %p951_p11 = scmp.ne.s32.totalorder %s949_s5, %s950_s6 }
  0x41   : > { %p952_p12 = pnand %p951_p11, %p1067_p5 }
  0x43   : > { %p953_p13 = pneg %p952_p12 }
  0x45   : > { %528 = vrot.lane.b32.xlu1 %v189_v7, %s1003_s7  ;;  %526 = vrot.lane.b32.xlu0 %v188_v6, %s1003_s7 }
  0x46   : > { %530 = vrot.lane.b32.xlu2 %v190_v5, %s1003_s7 }
  0x4d   : > { %586 = vrot.lane.b32.xlu1 %v189_v7, %s1004_s8  ;;  %584 = vrot.lane.b32.xlu0 %v188_v6, %s1004_s8 }
  0x4e   : > { %588 = vrot.lane.b32.xlu2 %v190_v5, %s1004_s8 }
  0x55   : > { %644 = vrot.lane.b32.xlu1 %v189_v7, %s1005_s9  ;;  %642 = vrot.lane.b32.xlu0 %v188_v6, %s1005_s9 }
  0x56   : > { %646 = vrot.lane.b32.xlu2 %v190_v5, %s1005_s9  ;;  %s954_s9 = scalar_lea.hbm %s1190_s3, 64 }
  0x57   : > { %p956_p1 = scmp.lt.s32.totalorder %s954_s9, %s950_s6 }
  0x59   : > { %p957_p2 = por %p956_p1, %p955_p0 }
  0x5b   : > { %p958_p3 = pnand %p957_p2, %p953_p13 }
  0x5d   : > { %696 = vperm.xlu0 %932, %v692_v59   ;;  %701 = vperm.xlu1 %933, %v693_v60  }
  0x78   : > { %v297_v11 = vpop.permute.xlu2 %296 }
  0x80   : > { %v299_v12 = vpop.permute.xlu2 %298 }
  0x81   : > { %v302_v16 = vsel %vm300_vm2, %v297_v11, %v299_v12  ;;  %v877_v12 = vld [vmem:[%s1187_s0 + $0x30] sm:$0xff] }
  0x82   : > { %v310_v22 = vsel %vm204_vm0, %v302_v16, 0 }
  0x88   : > { %v357_v15 = vpop.permute.xlu2 %356 }
  0x8f   : > { %v196_v13 = vpop.permute.xlu1 %195  ;;  %v192_v14 = vpop.permute.xlu0 %191 }
  0x90   : > { %v415_v27 = vpop.permute.xlu2 %414 }
  0x97   : > { %v295_v17 = vpop.permute.xlu1 %294  ;;  %v194_v18 = vpop.permute.xlu0 %193 }
  0x98   : > { %v198_v19 = vsel %vm197_vm3, %v192_v14, %v194_v18  ;;  %v199_v20 = vsel %vm197_vm3, %v194_v18, %v196_v13  ;;  %v301_v21 = vsel %vm300_vm2, %v295_v17, %v297_v11  ;;  %v473_v42 = vpop.permute.xlu2 %472  ;;  %v879_v13 = vld [vmem:[%s1187_s0 + $0x40] sm:$0xff] }
  0x99   : > { %v206_v23 = vsel %vm204_vm0, %v198_v19, 0  ;;  %v209_v24 = vsel %vm204_vm0, %v199_v20, 0  ;;  %v307_v25 = vsel %vm204_vm0, %v301_v21, 0 }
  0x9a   : > { %218 = vmatpush.bf16.msra.mxu0 %v206_v23  ;;  %232 = vmatpush.bf16.msra.mxu1 %v209_v24 }
  0x9d   : > { %802 = vmatmul.msk.bf16.vlgmr.msra.gmra.mxu0 %vm200_vm1, %v872_v26  ;;  %803 = vmatmul.msk.bf16.vlgmr.msra.gmra.mxu1 %vm200_vm1, %v872_v26 }
  0x9e   : > { %319 = vmatpush.bf16.msrb.mxu0 %v307_v25  ;;  %333 = vmatpush.bf16.msrb.mxu1 %v310_v22 }
  0x9f   : > { %v355_v28 = vpop.permute.xlu1 %354  ;;  %v353_v29 = vpop.permute.xlu0 %352 }
  0xa0   : > { %v359_v30 = vsel %vm358_vm4, %v353_v29, %v355_v28  ;;  %v360_v31 = vsel %vm358_vm4, %v355_v28, %v357_v15  ;;  %v531_v50 = vpop.permute.xlu2 %530 }
  0xa1   : > { %v365_v32 = vsel %vm204_vm0, %v359_v30, 0  ;;  %v368_v33 = vsel %vm204_vm0, %v360_v31, 0 }
  0xa2   : > { %377 = vmatpush.bf16.msrb.mxu2 %v365_v32  ;;  %391 = vmatpush.bf16.msrb.mxu3 %v368_v33 }
  0xa4   : > { %v267_v14 = vpop.f32.mrf.mxu2 }
  0xa5   : > { %824 = vmatmul.msk.bf16.vlgmr.msrb.gmra.mxu2 %vm200_vm1, %v874_v34  ;;  %825 = vmatmul.msk.bf16.vlgmr.msrb.gmra.mxu3 %vm200_vm1, %v874_v34  ;;  %v281_v15 = vpop.f32.mrf.mxu3 }
  0xa7   : > { %v413_v35 = vpop.permute.xlu1 %412  ;;  %v411_v36 = vpop.permute.xlu0 %410 }
  0xa8   : > { %v418_v37 = vsel %vm416_vm5, %v413_v35, %v415_v27  ;;  %v417_v38 = vsel %vm416_vm5, %v411_v36, %v413_v35  ;;  %v589_v58 = vpop.permute.xlu2 %588 }
  0xa9   : > { %v426_v39 = vsel %vm204_vm0, %v418_v37, 0  ;;  %v423_v40 = vsel %vm204_vm0, %v417_v38, 0 }
  0xaa   : > { %435 = vmatpush.bf16.msra.mxu0 %v423_v40  ;;  %449 = vmatpush.bf16.msra.mxu1 %v426_v39 }
  0xac   : > { %v269_v20 = vpop.f32.mrf.mxu2 }
  0xad   : > { %816 = vmatmul.msk.bf16.vlgmr.msrb.gmra.mxu0 %vm200_vm1, %v873_v41  ;;  %817 = vmatmul.msk.bf16.vlgmr.msrb.gmra.mxu1 %vm200_vm1, %v873_v41  ;;  %v283_v21 = vpop.f32.mrf.mxu3 }
  0xaf   : > { %v471_v43 = vpop.permute.xlu1 %470  ;;  %v469_v44 = vpop.permute.xlu0 %468 }
  0xb0   : > { %v476_v45 = vsel %vm474_vm6, %v471_v43, %v473_v42  ;;  %v475_v46 = vsel %vm474_vm6, %v469_v44, %v471_v43  ;;  %v647_v5 = vpop.permute.xlu2 %646 }
  0xb1   : > { %v484_v47 = vsel %vm204_vm0, %v476_v45, 0  ;;  %v481_v48 = vsel %vm204_vm0, %v475_v46, 0 }
  0xb2   : > { %493 = vmatpush.bf16.msra.mxu2 %v481_v48  ;;  %507 = vmatpush.bf16.msra.mxu3 %v484_v47 }
  0xb5   : > { %840 = vmatmul.msk.bf16.vlgmr.msra.gmra.mxu2 %vm200_vm1, %v876_v49  ;;  %841 = vmatmul.msk.bf16.vlgmr.msra.gmra.mxu3 %vm200_vm1, %v876_v49 }
  0xb7   : > { %v529_v51 = vpop.permute.xlu1 %528  ;;  %v527_v52 = vpop.permute.xlu0 %526 }
  0xb8   : > { %v534_v53 = vsel %vm532_vm7, %v529_v51, %v531_v50  ;;  %v533_v54 = vsel %vm532_vm7, %v527_v52, %v529_v51 }
  0xb9   : > { %v542_v55 = vsel %vm204_vm0, %v534_v53, 0  ;;  %v539_v56 = vsel %vm204_vm0, %v533_v54, 0 }
  0xba   : > { %551 = vmatpush.bf16.msrb.mxu0 %v539_v56  ;;  %565 = vmatpush.bf16.msrb.mxu1 %v542_v55 }
  0xbd   : > { %832 = vmatmul.msk.bf16.vlgmr.msra.gmra.mxu0 %vm200_vm1, %v875_v57  ;;  %833 = vmatmul.msk.bf16.vlgmr.msra.gmra.mxu1 %vm200_vm1, %v875_v57 }
  0xbf   : > { %v587_v62 = vpop.permute.xlu1 %586  ;;  %v585_v63 = vpop.permute.xlu0 %584 }
  0xc0   : > { %v592_v0 = vsel %vm590_vm8, %v587_v62, %v589_v58  ;;  %v591_v1 = vsel %vm590_vm8, %v585_v63, %v587_v62 }
  0xc1   : > { %v600_v2 = vsel %vm204_vm0, %v592_v0, 0  ;;  %v597_v3 = vsel %vm204_vm0, %v591_v1, 0 }
  0xc2   : > { %609 = vmatpush.bf16.msrb.mxu2 %v597_v3  ;;  %623 = vmatpush.bf16.msrb.mxu3 %v600_v2 }
  0xc5   : > { %856 = vmatmul.msk.bf16.vlgmr.msrb.gmra.mxu2 %vm200_vm1, %v878_v4  ;;  %857 = vmatmul.msk.bf16.vlgmr.msrb.gmra.mxu3 %vm200_vm1, %v878_v4 }
  0xc7   : > { %v645_v6 = vpop.permute.xlu1 %644  ;;  %v643_v7 = vpop.permute.xlu0 %642 }
  0xc8   : > { %v650_v8 = vsel %vm648_vm9, %v645_v6, %v647_v5  ;;  %v649_v9 = vsel %vm648_vm9, %v643_v7, %v645_v6 }
  0xc9   : > { %v658_v10 = vsel %vm204_vm0, %v650_v8, 0  ;;  %v655_v11 = vsel %vm204_vm0, %v649_v9, 0 }
  0xca   : > { %667 = vmatpush.bf16.msra.mxu0 %v655_v11  ;;  %681 = vmatpush.bf16.msra.mxu1 %v658_v10 }
  0xcd   : > { %848 = vmatmul.msk.bf16.vlgmr.msrb.gmra.mxu0 %vm200_vm1, %v877_v12  ;;  %849 = vmatmul.msk.bf16.vlgmr.msrb.gmra.mxu1 %vm200_vm1, %v877_v12 }
  0xcf   : > { %v697_v2 = vpop.permute.xlu0 %696 }
  0xdd   : > { %864 = vmatmul.msk.bf16.vlgmr.msra.gmra.mxu0 %vm200_vm1, %v879_v13  ;;  %865 = vmatmul.msk.bf16.vlgmr.msra.gmra.mxu1 %vm200_vm1, %v879_v13 }
 0x11a   : > { %v220_v16 = vpop.f32.mrf.mxu0  ;;  %v234_v17 = vpop.f32.mrf.mxu1 }
 0x11b   : > { %v268_v36 = vadd.f32 %v267_v14, %v220_v16  ;;  %v282_v37 = vadd.f32 %v281_v15, %v234_v17  ;;  %v702_v17 = vpop.permute.xlu1 %701 }
 0x122   : > { %v222_v18 = vpop.f32.mrf.mxu0  ;;  %v236_v19 = vpop.f32.mrf.mxu1 }
 0x123   : > { %v270_v46 = vadd.f32 %v269_v20, %v222_v18  ;;  %v284_v47 = vadd.f32 %v283_v21, %v236_v19 }
 0x128   : > { %v379_v24 = vpop.f32.mrf.mxu2  ;;  %v393_v25 = vpop.f32.mrf.mxu3 }
 0x12a   : > { %v321_v22 = vpop.f32.mrf.mxu0  ;;  %v335_v23 = vpop.f32.mrf.mxu1 }
 0x12b   : > { %v340_v38 = vadd.f32 %v321_v22, %v268_v36  ;;  %v341_v39 = vadd.f32 %v335_v23, %v282_v37 }
 0x12d   : > { %v398_v44 = vadd.f32 %v379_v24, %v340_v38  ;;  %v399_v45 = vadd.f32 %v393_v25, %v341_v39 }
 0x130   : > { %v381_v28 = vpop.f32.mrf.mxu2  ;;  %v395_v29 = vpop.f32.mrf.mxu3 }
 0x132   : > { %v323_v26 = vpop.f32.mrf.mxu0  ;;  %v337_v27 = vpop.f32.mrf.mxu1 }
 0x133   : > { %v342_v50 = vadd.f32 %v323_v26, %v270_v46  ;;  %v343_v51 = vadd.f32 %v337_v27, %v284_v47 }
 0x135   : > { %v400_v58 = vadd.f32 %v381_v28, %v342_v50  ;;  %v401_v59 = vadd.f32 %v395_v29, %v343_v51 }
 0x138   : > { %v495_v32 = vpop.f32.mrf.mxu2  ;;  %v509_v33 = vpop.f32.mrf.mxu3 }
 0x13a   : > { %v437_v30 = vpop.f32.mrf.mxu0  ;;  %v451_v31 = vpop.f32.mrf.mxu1 }
 0x13b   : > { %v456_v48 = vadd.f32 %v437_v30, %v398_v44  ;;  %v457_v49 = vadd.f32 %v451_v31, %v399_v45 }
 0x13d   : > { %v514_v54 = vadd.f32 %v495_v32, %v456_v48  ;;  %v515_v55 = vadd.f32 %v509_v33, %v457_v49 }
 0x140   : > { %v497_v40 = vpop.f32.mrf.mxu2  ;;  %v511_v41 = vpop.f32.mrf.mxu3 }
 0x142   : > { %v439_v34 = vpop.f32.mrf.mxu0  ;;  %v453_v35 = vpop.f32.mrf.mxu1 }
 0x143   : > { %v458_v62 = vadd.f32 %v439_v34, %v400_v58  ;;  %v459_v63 = vadd.f32 %v453_v35, %v401_v59 }
 0x145   : > { %v516_v5 = vadd.f32 %v497_v40, %v458_v62  ;;  %v517_v6 = vadd.f32 %v511_v41, %v459_v63 }
 0x148   : > { %v611_v56 = vpop.f32.mrf.mxu2  ;;  %v625_v57 = vpop.f32.mrf.mxu3 }
 0x14a   : > { %v553_v42 = vpop.f32.mrf.mxu0  ;;  %v567_v43 = vpop.f32.mrf.mxu1 }
 0x14b   : > { %v572_v60 = vadd.f32 %v553_v42, %v514_v54  ;;  %v573_v61 = vadd.f32 %v567_v43, %v515_v55 }
 0x14d   : > { %v630_v0 = vadd.f32 %v611_v56, %v572_v60  ;;  %v631_v1 = vadd.f32 %v625_v57, %v573_v61 }
 0x150   : > { %v613_v13 = vpop.f32.mrf.mxu2  ;;  %v627_v14 = vpop.f32.mrf.mxu3 }
 0x152   : > { %v555_v52 = vpop.f32.mrf.mxu0  ;;  %v569_v53 = vpop.f32.mrf.mxu1 }
 0x153   : > { %v574_v9 = vadd.f32 %v555_v52, %v516_v5  ;;  %v575_v10 = vadd.f32 %v569_v53, %v517_v6 }
 0x155   : > { %v632_v15 = vadd.f32 %v613_v13, %v574_v9  ;;  %v633_v16 = vadd.f32 %v627_v14, %v575_v10 }
 0x15a   : > { %v669_v3 = vpop.f32.mrf.mxu0  ;;  %v683_v4 = vpop.f32.mrf.mxu1 }
 0x15b   : > { %v688_v7 = vadd.f32 %v669_v3, %v630_v0  ;;  %v689_v8 = vadd.f32 %v683_v4, %v631_v1 }
 0x15d   : > { %v704_v11 = vadd.f32 %v697_v2, %v688_v7  ;;  %v705_v12 = vadd.f32 %v697_v2, %v689_v8 }
 0x15f   : > { %708 = vst [vmem:[%s163_s26] sm:$0xff] %v704_v11 }
 0x160   : > { %709 = vst [vmem:[%s163_s26 + $0x8] sm:$0xff] %v705_v12 }
 0x162   : > { %v671_v18 = vpop.f32.mrf.mxu0  ;;  %v685_v19 = vpop.f32.mrf.mxu1 }
 0x163   : > { %v690_v20 = vadd.f32 %v671_v18, %v632_v15  ;;  %v691_v21 = vadd.f32 %v685_v19, %v633_v16 }
 0x165   : > { %v706_v22 = vadd.f32 %v702_v17, %v690_v20  ;;  %v707_v23 = vadd.f32 %v702_v17, %v691_v21 }
 0x167   : > { %710 = vst [vmem:[%s163_s26 + $0x10] sm:$0xff] %v706_v22 }
 0x168   : > { %711 = vst [vmem:[%s163_s26 + $0x18] sm:$0xff] %v707_v23 }
 0x169   : > { %961 = shalt.err (!%p958_p3)
}
 0x16a   : > { %s1007_s17 = smov 256   ;;  %s1008_s19 = smov 16  }
 0x16b   : > { %882 = dma.vmem_to_hbm [thread:$0]  (%p1067_p5), %s726_s30, 512, %s728_s16, %s713_s4, %s1007_s17, %s1007_s17, %s1008_s19  }
 0x16c PF: > { %p888_p4 = scmp.ge.s32.totalorder %s996_s15, 2  ;;  %s742_s20 = sand.u32 1, %s984_s12  }
 0x16d   : > { %s743_s24 = scalar_lea.sflag [#allocation3], %s742_s20 }
 0x16e   : > { %p885_p7 = pnand %p888_p4, %p1071_p6 }
 0x170   : > { %p886_p8 = pneg %p885_p7 }
 0x172   : > { %979 = dma.done.wait (%p886_p8), %s743_s24, 512  }
 0x173   : > { %981 = vsyncadd (%p886_p8), %s743_s24, 4294966784  ;;  %p13_p9 = scmp.ge.s32.totalorder %s1054_s18, 4   ;;  %s1193_s12 = smov %s988_s13 }
 0x174   : > { %s1194_s13 = smov %s992_s14  ;;  %s1195_s14 = smov %s1065_s21 }
 0x175   : > { %s1196_s15 = smov %s1054_s18  ;;  %15 = sbr.rel (!%p13_p9) target bundleno = 3 (0x3), region = 75 }
 0x17a   :  { %749 = vsyncpa [#allocation3], 1 }
 0x17b   :  { %751 = vsyncpa [#allocation3 + $0x1], 1 }

// kernel: tpu_custom_call.1
= control target key start
LH: loop header
LB: loop body
LE: loop exit
PB: predicated region body
PF: predicated region fallthrough
CT: control target
= control target key end

     0   :  { %8 = vsyncpa [#allocation3], 0  ;;  %s1187_s0 = inlined_call_operand.vmem [shape: bf16[9,16,8], index: 0, kind: input, shape index: {}]   ;;  %s1188_s1 = inlined_call_operand.vmem [shape: f32[16,1], index: 1, kind: input, shape index: {}]   ;;  %s1189_s2 = inlined_call_operand.vmem [shape: bf16[2,8,384], index: 2, kind: input, shape index: {}]   ;;  %s1190_s3 = inlined_call_operand.hbm [shape: f32[2,16,256], index: 3, kind: output, shape index: {}]  }
   0x1   :  { %10 = vsyncpa [#allocation3 + $0x1], 0  ;;  %s1029_s12 = smov 0   ;;  %s1031_s13 = smov 0  }
   0x2   :  { %s1033_s14 = smov 0   ;;  %s1035_s15 = smov 0  }
   0x3 LB: > { %s1050_s16 = sadd.s32 4294967295, %s996_s15   ;;  %s790_s17 = sadd.s32 4294967294, %s996_s15   ;;  %s996_s15 = sphi %s1035_s15, %s1196_s15   ;;  %s992_s14 = sphi %s1033_s14, %s1195_s14   ;;  %s988_s13 = sphi %s1031_s13, %s1194_s13   ;;  %s984_s12 = sphi %s1029_s12, %s1193_s12  }
   0x4   : > { %s1054_s18 = sadd.s32 1, %s996_s15   ;;  %s91_s19 = sadd.s32 1, %s992_s14 }
   0x5   : > { %s88_s20 = ssub.s32 %s996_s15, %s1054_s18  ;;  %p101_p0 = scmp.ne.s32.totalorder %s992_s14, %s988_s13 }
   0x6   : > { %p89_p1 = scmp.eq.s32.totalorder %s88_s20, 0  ;;  %p102_p2 = scmp.eq.s32.totalorder %s1050_s16, 1 }
   0x7   : > { %p107_p3 = scmp.ne.s32.totalorder %s988_s13, %s984_s12  ;;  %p108_p4 = scmp.eq.s32.totalorder %s790_s17, 1 }
   0x8   : > { %s1065_s21 = scalar_select %p89_p1, %s992_s14, %s91_s19  }
   0x9   : > { %p1067_p5 = por %p102_p2, %p101_p0  ;;  %p1071_p6 = por %p108_p4, %p107_p3 }
   0xa   : > { %p793_p7 = scmp.ge.s32.totalorder %s996_s15, 1  ;;  %p140_p8 = scmp.lt.s32.totalorder %s996_s15, 3 }
   0xc   : > { %p141_p9 = pnand %p793_p7, %p140_p8 }
   0xd   : > { %p164_p10 = scmp.lt.s32.totalorder (!%p141_p9), %s1050_s16, 1  ;;  %s998_s29 = smov (!%p141_p9), 127  }
   0xe   : > { %144 = sbr.rel (%p141_p9) target bundleno = 364 (0x16c), region = 32  ;;  %s999_s30 = smov (!%p141_p9), 126  }
   0xf   : > { %s1000_s4 = smov (!%p141_p9), 112   ;;  %s1001_s5 = smov (!%p141_p9), 111  }
  0x10   : > { %s1002_s6 = smov (!%p141_p9), 110   ;;  %s1003_s7 = smov (!%p141_p9), 96  }
  0x11   : > { %s1004_s8 = smov (!%p141_p9), 95   ;;  %s1005_s9 = smov (!%p141_p9), 94  }
  0x12   : > { %s161_s20 = sand.u32 (!%p141_p9), 1, %s988_s13  }
  0x13   : > { %s165_s24 = scalar_select %p164_p10, %s1050_s16, 1  ;;  %vm204_vm0 = vcmask 1043456   ;;  %v871_v10 = vld [vmem:[%s1187_s0] sm:$0xff]  ;;  %vm200_vm1 = vcmask 64512   ;;  %vm300_vm2 = vcmask 1031168   ;;  %vm197_vm3 = vcmask 1039360  }
  0x14   : > { %v872_v26 = vld [vmem:[%s1187_s0 + $0x8] sm:$0xff]  ;;  %vm358_vm4 = vcmask 916480   ;;  %v874_v34 = vld [vmem:[%s1187_s0 + $0x18] sm:$0xff]  ;;  %vm416_vm5 = vcmask 908288   ;;  %v873_v41 = vld [vmem:[%s1187_s0 + $0x10] sm:$0xff]  ;;  %vm474_vm6 = vcmask 900096  }
  0x15   : > { %s881_s25 = smul.u32 12, %s165_s24  ;;  %v876_v49 = vld [vmem:[%s1187_s0 + $0x28] sm:$0xff]  ;;  %vm532_vm7 = vcmask 785408   ;;  %v875_v57 = vld [vmem:[%s1187_s0 + $0x20] sm:$0xff]  ;;  %vm590_vm8 = vcmask 777216   ;;  %v1006_v61 = vmov 0  }
  0x16   : > { %v692_v59 = vld [vmem:[%s1188_s1] sm:$0xff]  ;;  %v693_v60 = vld [vmem:[%s1188_s1 + $0x8] sm:$0xff]  ;;  %932 = vset.pattern.permute.xlu0 %v1006_v61  ;;  %933 = vset.pattern.permute.xlu1 %v1006_v61  ;;  %vm648_vm9 = vcmask 769024   ;;  %s794_s24 = sshll.u32 %s161_s20, 5 }
  0x17   : > { %s168_s28 = scalar_lea.vmem %s1189_s2, %s881_s25  ;;  %s880_s25 = sshll.u32 %s1050_s16, 5 }
  0x18   : > { %v174_v0 = vld [vmem:[%s168_s28 + $0x8] sm:$0xf]  ;;  %v173_v1 = vld [vmem:[%s168_s28] sm:$0xff]  ;;  %s163_s26 = scalar_lea.vmem [#allocation2], %s794_s24 }
  0x19   : > { %v187_v2 = vunpack.c.l.b16 %v174_v0  ;;  %v185_v3 = vunpack.c.l.b16 %v173_v1  ;;  %v186_v4 = vunpack.c.h.b16 %v173_v1 }
  0x1b   : > { %v190_v5 = vpack.c.b16 %v187_v2, %v187_v2  ;;  %v188_v6 = vpack.c.b16 %v185_v3, %v185_v3  ;;  %v189_v7 = vpack.c.b16 %v186_v4, %v186_v4  ;;  %v878_v4 = vld [vmem:[%s1187_s0 + $0x38] sm:$0xff] }
  0x1d   : > { %195 = vrot.lane.b32.xlu1 %v190_v5, %s998_s29  ;;  %191 = vrot.lane.b32.xlu0 %v188_v6, %s998_s29  ;;  %v253_v8 = vsel %vm204_vm0, %v188_v6, 0  ;;  %v256_v9 = vsel %vm204_vm0, %v189_v7, 0 }
  0x1e   : > { %296 = vrot.lane.b32.xlu2 %v189_v7, %s999_s30  ;;  %265 = vmatpush.bf16.msra.mxu2 %v253_v8 }
  0x1f   : > { %279 = vmatpush.bf16.msra.mxu3 %v256_v9 }
  0x21   : > { %808 = vmatmul.msk.bf16.vlgmr.msra.gmra.mxu2 %vm200_vm1, %v871_v10 }
  0x22   : > { %809 = vmatmul.msk.bf16.vlgmr.msra.gmra.mxu3 %vm200_vm1, %v871_v10 }
  0x25   : > { %294 = vrot.lane.b32.xlu1 %v188_v6, %s999_s30  ;;  %193 = vrot.lane.b32.xlu0 %v189_v7, %s998_s29  ;;  %s724_s29 = scalar_lea.hbm %s1190_s3, %s880_s25 }
  0x26   : > { %298 = vrot.lane.b32.xlu2 %v190_v5, %s999_s30  ;;  %s725_s30 = sshll.u32 %s163_s26, 4  ;;  %s727_s16 = sshll.u32 %s724_s29, 4  ;;  %s726_s30 = int_to_ptr.vmem [resolvable:$true] %s725_s30  ;;  %s728_s16 = int_to_ptr.hbm [resolvable:$true] %s727_s16 }
  0x2d   : > { %354 = vrot.lane.b32.xlu1 %v189_v7, %s1000_s4  ;;  %352 = vrot.lane.b32.xlu0 %v188_v6, %s1000_s4 }
  0x2e   : > { %356 = vrot.lane.b32.xlu2 %v190_v5, %s1000_s4  ;;  %s713_s4 = scalar_lea.sflag [#allocation3], %s161_s20 }
  0x35   : > { %412 = vrot.lane.b32.xlu1 %v189_v7, %s1001_s5  ;;  %410 = vrot.lane.b32.xlu0 %v188_v6, %s1001_s5 }
  0x36   : > { %414 = vrot.lane.b32.xlu2 %v190_v5, %s1001_s5  ;;  %s948_s5 = sshra.s32 %s728_s16, 4  ;;  %s949_s5 = int_to_ptr.hbm [resolvable:$true] %s948_s5 }
  0x37   : > { %p955_p0 = scmp.lt.s32.totalorder %s949_s5, %s1190_s3 }
  0x3d   : > { %470 = vrot.lane.b32.xlu1 %v189_v7, %s1002_s6  ;;  %468 = vrot.lane.b32.xlu0 %v188_v6, %s1002_s6 }
  0x3e   : > { %472 = vrot.lane.b32.xlu2 %v190_v5, %s1002_s6  ;;  %s950_s6 = scalar_lea.hbm %s949_s5, 32 }
  0x3f   : > { %p951_p11 = scmp.ne.s32.totalorder %s949_s5, %s950_s6 }
  0x41   : > { %p952_p12 = pnand %p951_p11, %p1067_p5 }
  0x43   : > { %p953_p13 = pneg %p952_p12 }
  0x45   : > { %528 = vrot.lane.b32.xlu1 %v189_v7, %s1003_s7  ;;  %526 = vrot.lane.b32.xlu0 %v188_v6, %s1003_s7 }
  0x46   : > { %530 = vrot.lane.b32.xlu2 %v190_v5, %s1003_s7 }
  0x4d   : > { %586 = vrot.lane.b32.xlu1 %v189_v7, %s1004_s8  ;;  %584 = vrot.lane.b32.xlu0 %v188_v6, %s1004_s8 }
  0x4e   : > { %588 = vrot.lane.b32.xlu2 %v190_v5, %s1004_s8 }
  0x55   : > { %644 = vrot.lane.b32.xlu1 %v189_v7, %s1005_s9  ;;  %642 = vrot.lane.b32.xlu0 %v188_v6, %s1005_s9 }
  0x56   : > { %646 = vrot.lane.b32.xlu2 %v190_v5, %s1005_s9  ;;  %s954_s9 = scalar_lea.hbm %s1190_s3, 64 }
  0x57   : > { %p956_p1 = scmp.lt.s32.totalorder %s954_s9, %s950_s6 }
  0x59   : > { %p957_p2 = por %p956_p1, %p955_p0 }
  0x5b   : > { %p958_p3 = pnand %p957_p2, %p953_p13 }
  0x5d   : > { %696 = vperm.xlu0 %932, %v692_v59   ;;  %701 = vperm.xlu1 %933, %v693_v60  }
  0x78   : > { %v297_v11 = vpop.permute.xlu2 %296 }
  0x80   : > { %v299_v12 = vpop.permute.xlu2 %298 }
  0x81   : > { %v302_v16 = vsel %vm300_vm2, %v297_v11, %v299_v12  ;;  %v877_v12 = vld [vmem:[%s1187_s0 + $0x30] sm:$0xff] }
  0x82   : > { %v310_v22 = vsel %vm204_vm0, %v302_v16, 0 }
  0x88   : > { %v357_v15 = vpop.permute.xlu2 %356 }
  0x8f   : > { %v196_v13 = vpop.permute.xlu1 %195  ;;  %v192_v14 = vpop.permute.xlu0 %191 }
  0x90   : > { %v415_v27 = vpop.permute.xlu2 %414 }
  0x97   : > { %v295_v17 = vpop.permute.xlu1 %294  ;;  %v194_v18 = vpop.permute.xlu0 %193 }
  0x98   : > { %v198_v19 = vsel %vm197_vm3, %v192_v14, %v194_v18  ;;  %v199_v20 = vsel %vm197_vm3, %v194_v18, %v196_v13  ;;  %v301_v21 = vsel %vm300_vm2, %v295_v17, %v297_v11  ;;  %v473_v42 = vpop.permute.xlu2 %472  ;;  %v879_v13 = vld [vmem:[%s1187_s0 + $0x40] sm:$0xff] }
  0x99   : > { %v206_v23 = vsel %vm204_vm0, %v198_v19, 0  ;;  %v209_v24 = vsel %vm204_vm0, %v199_v20, 0  ;;  %v307_v25 = vsel %vm204_vm0, %v301_v21, 0 }
  0x9a   : > { %218 = vmatpush.bf16.msra.mxu0 %v206_v23  ;;  %232 = vmatpush.bf16.msra.mxu1 %v209_v24 }
  0x9d   : > { %802 = vmatmul.msk.bf16.vlgmr.msra.gmra.mxu0 %vm200_vm1, %v872_v26  ;;  %803 = vmatmul.msk.bf16.vlgmr.msra.gmra.mxu1 %vm200_vm1, %v872_v26 }
  0x9e   : > { %319 = vmatpush.bf16.msrb.mxu0 %v307_v25  ;;  %333 = vmatpush.bf16.msrb.mxu1 %v310_v22 }
  0x9f   : > { %v355_v28 = vpop.permute.xlu1 %354  ;;  %v353_v29 = vpop.permute.xlu0 %352 }
  0xa0   : > { %v359_v30 = vsel %vm358_vm4, %v353_v29, %v355_v28  ;;  %v360_v31 = vsel %vm358_vm4, %v355_v28, %v357_v15  ;;  %v531_v50 = vpop.permute.xlu2 %530 }
  0xa1   : > { %v365_v32 = vsel %vm204_vm0, %v359_v30, 0  ;;  %v368_v33 = vsel %vm204_vm0, %v360_v31, 0 }
  0xa2   : > { %377 = vmatpush.bf16.msrb.mxu2 %v365_v32  ;;  %391 = vmatpush.bf16.msrb.mxu3 %v368_v33 }
  0xa4   : > { %v267_v14 = vpop.f32.mrf.mxu2 }
  0xa5   : > { %824 = vmatmul.msk.bf16.vlgmr.msrb.gmra.mxu2 %vm200_vm1, %v874_v34  ;;  %825 = vmatmul.msk.bf16.vlgmr.msrb.gmra.mxu3 %vm200_vm1, %v874_v34  ;;  %v281_v15 = vpop.f32.mrf.mxu3 }
  0xa7   : > { %v413_v35 = vpop.permute.xlu1 %412  ;;  %v411_v36 = vpop.permute.xlu0 %410 }
  0xa8   : > { %v418_v37 = vsel %vm416_vm5, %v413_v35, %v415_v27  ;;  %v417_v38 = vsel %vm416_vm5, %v411_v36, %v413_v35  ;;  %v589_v58 = vpop.permute.xlu2 %588 }
  0xa9   : > { %v426_v39 = vsel %vm204_vm0, %v418_v37, 0  ;;  %v423_v40 = vsel %vm204_vm0, %v417_v38, 0 }
  0xaa   : > { %435 = vmatpush.bf16.msra.mxu0 %v423_v40  ;;  %449 = vmatpush.bf16.msra.mxu1 %v426_v39 }
  0xac   : > { %v269_v20 = vpop.f32.mrf.mxu2 }
  0xad   : > { %816 = vmatmul.msk.bf16.vlgmr.msrb.gmra.mxu0 %vm200_vm1, %v873_v41  ;;  %817 = vmatmul.msk.bf16.vlgmr.msrb.gmra.mxu1 %vm200_vm1, %v873_v41  ;;  %v283_v21 = vpop.f32.mrf.mxu3 }
  0xaf   : > { %v471_v43 = vpop.permute.xlu1 %470  ;;  %v469_v44 = vpop.permute.xlu0 %468 }
  0xb0   : > { %v476_v45 = vsel %vm474_vm6, %v471_v43, %v473_v42  ;;  %v475_v46 = vsel %vm474_vm6, %v469_v44, %v471_v43  ;;  %v647_v5 = vpop.permute.xlu2 %646 }
  0xb1   : > { %v484_v47 = vsel %vm204_vm0, %v476_v45, 0  ;;  %v481_v48 = vsel %vm204_vm0, %v475_v46, 0 }
  0xb2   : > { %493 = vmatpush.bf16.msra.mxu2 %v481_v48  ;;  %507 = vmatpush.bf16.msra.mxu3 %v484_v47 }
  0xb5   : > { %840 = vmatmul.msk.bf16.vlgmr.msra.gmra.mxu2 %vm200_vm1, %v876_v49  ;;  %841 = vmatmul.msk.bf16.vlgmr.msra.gmra.mxu3 %vm200_vm1, %v876_v49 }
  0xb7   : > { %v529_v51 = vpop.permute.xlu1 %528  ;;  %v527_v52 = vpop.permute.xlu0 %526 }
  0xb8   : > { %v534_v53 = vsel %vm532_vm7, %v529_v51, %v531_v50  ;;  %v533_v54 = vsel %vm532_vm7, %v527_v52, %v529_v51 }
  0xb9   : > { %v542_v55 = vsel %vm204_vm0, %v534_v53, 0  ;;  %v539_v56 = vsel %vm204_vm0, %v533_v54, 0 }
  0xba   : > { %551 = vmatpush.bf16.msrb.mxu0 %v539_v56  ;;  %565 = vmatpush.bf16.msrb.mxu1 %v542_v55 }
  0xbd   : > { %832 = vmatmul.msk.bf16.vlgmr.msra.gmra.mxu0 %vm200_vm1, %v875_v57  ;;  %833 = vmatmul.msk.bf16.vlgmr.msra.gmra.mxu1 %vm200_vm1, %v875_v57 }
  0xbf   : > { %v587_v62 = vpop.permute.xlu1 %586  ;;  %v585_v63 = vpop.permute.xlu0 %584 }
  0xc0   : > { %v592_v0 = vsel %vm590_vm8, %v587_v62, %v589_v58  ;;  %v591_v1 = vsel %vm590_vm8, %v585_v63, %v587_v62 }
  0xc1   : > { %v600_v2 = vsel %vm204_vm0, %v592_v0, 0  ;;  %v597_v3 = vsel %vm204_vm0, %v591_v1, 0 }
  0xc2   : > { %609 = vmatpush.bf16.msrb.mxu2 %v597_v3  ;;  %623 = vmatpush.bf16.msrb.mxu3 %v600_v2 }
  0xc5   : > { %856 = vmatmul.msk.bf16.vlgmr.msrb.gmra.mxu2 %vm200_vm1, %v878_v4  ;;  %857 = vmatmul.msk.bf16.vlgmr.msrb.gmra.mxu3 %vm200_vm1, %v878_v4 }
  0xc7   : > { %v645_v6 = vpop.permute.xlu1 %644  ;;  %v643_v7 = vpop.permute.xlu0 %642 }
  0xc8   : > { %v650_v8 = vsel %vm648_vm9, %v645_v6, %v647_v5  ;;  %v649_v9 = vsel %vm648_vm9, %v643_v7, %v645_v6 }
  0xc9   : > { %v658_v10 = vsel %vm204_vm0, %v650_v8, 0  ;;  %v655_v11 = vsel %vm204_vm0, %v649_v9, 0 }
  0xca   : > { %667 = vmatpush.bf16.msra.mxu0 %v655_v11  ;;  %681 = vmatpush.bf16.msra.mxu1 %v658_v10 }
  0xcd   : > { %848 = vmatmul.msk.bf16.vlgmr.msrb.gmra.mxu0 %vm200_vm1, %v877_v12  ;;  %849 = vmatmul.msk.bf16.vlgmr.msrb.gmra.mxu1 %vm200_vm1, %v877_v12 }
  0xcf   : > { %v697_v2 = vpop.permute.xlu0 %696 }
  0xdd   : > { %864 = vmatmul.msk.bf16.vlgmr.msra.gmra.mxu0 %vm200_vm1, %v879_v13  ;;  %865 = vmatmul.msk.bf16.vlgmr.msra.gmra.mxu1 %vm200_vm1, %v879_v13 }
 0x11a   : > { %v220_v16 = vpop.f32.mrf.mxu0  ;;  %v234_v17 = vpop.f32.mrf.mxu1 }
 0x11b   : > { %v268_v36 = vadd.f32 %v267_v14, %v220_v16  ;;  %v282_v37 = vadd.f32 %v281_v15, %v234_v17  ;;  %v702_v17 = vpop.permute.xlu1 %701 }
 0x122   : > { %v222_v18 = vpop.f32.mrf.mxu0  ;;  %v236_v19 = vpop.f32.mrf.mxu1 }
 0x123   : > { %v270_v46 = vadd.f32 %v269_v20, %v222_v18  ;;  %v284_v47 = vadd.f32 %v283_v21, %v236_v19 }
 0x128   : > { %v379_v24 = vpop.f32.mrf.mxu2  ;;  %v393_v25 = vpop.f32.mrf.mxu3 }
 0x12a   : > { %v321_v22 = vpop.f32.mrf.mxu0  ;;  %v335_v23 = vpop.f32.mrf.mxu1 }
 0x12b   : > { %v340_v38 = vadd.f32 %v321_v22, %v268_v36  ;;  %v341_v39 = vadd.f32 %v335_v23, %v282_v37 }
 0x12d   : > { %v398_v44 = vadd.f32 %v379_v24, %v340_v38  ;;  %v399_v45 = vadd.f32 %v393_v25, %v341_v39 }
 0x130   : > { %v381_v28 = vpop.f32.mrf.mxu2  ;;  %v395_v29 = vpop.f32.mrf.mxu3 }
 0x132   : > { %v323_v26 = vpop.f32.mrf.mxu0  ;;  %v337_v27 = vpop.f32.mrf.mxu1 }
 0x133   : > { %v342_v50 = vadd.f32 %v323_v26, %v270_v46  ;;  %v343_v51 = vadd.f32 %v337_v27, %v284_v47 }
 0x135   : > { %v400_v58 = vadd.f32 %v381_v28, %v342_v50  ;;  %v401_v59 = vadd.f32 %v395_v29, %v343_v51 }
 0x138   : > { %v495_v32 = vpop.f32.mrf.mxu2  ;;  %v509_v33 = vpop.f32.mrf.mxu3 }
 0x13a   : > { %v437_v30 = vpop.f32.mrf.mxu0  ;;  %v451_v31 = vpop.f32.mrf.mxu1 }
 0x13b   : > { %v456_v48 = vadd.f32 %v437_v30, %v398_v44  ;;  %v457_v49 = vadd.f32 %v451_v31, %v399_v45 }
 0x13d   : > { %v514_v54 = vadd.f32 %v495_v32, %v456_v48  ;;  %v515_v55 = vadd.f32 %v509_v33, %v457_v49 }
 0x140   : > { %v497_v40 = vpop.f32.mrf.mxu2  ;;  %v511_v41 = vpop.f32.mrf.mxu3 }
 0x142   : > { %v439_v34 = vpop.f32.mrf.mxu0  ;;  %v453_v35 = vpop.f32.mrf.mxu1 }
 0x143   : > { %v458_v62 = vadd.f32 %v439_v34, %v400_v58  ;;  %v459_v63 = vadd.f32 %v453_v35, %v401_v59 }
 0x145   : > { %v516_v5 = vadd.f32 %v497_v40, %v458_v62  ;;  %v517_v6 = vadd.f32 %v511_v41, %v459_v63 }
 0x148   : > { %v611_v56 = vpop.f32.mrf.mxu2  ;;  %v625_v57 = vpop.f32.mrf.mxu3 }
 0x14a   : > { %v553_v42 = vpop.f32.mrf.mxu0  ;;  %v567_v43 = vpop.f32.mrf.mxu1 }
 0x14b   : > { %v572_v60 = vadd.f32 %v553_v42, %v514_v54  ;;  %v573_v61 = vadd.f32 %v567_v43, %v515_v55 }
 0x14d   : > { %v630_v0 = vadd.f32 %v611_v56, %v572_v60  ;;  %v631_v1 = vadd.f32 %v625_v57, %v573_v61 }
 0x150   : > { %v613_v13 = vpop.f32.mrf.mxu2  ;;  %v627_v14 = vpop.f32.mrf.mxu3 }
 0x152   : > { %v555_v52 = vpop.f32.mrf.mxu0  ;;  %v569_v53 = vpop.f32.mrf.mxu1 }
 0x153   : > { %v574_v9 = vadd.f32 %v555_v52, %v516_v5  ;;  %v575_v10 = vadd.f32 %v569_v53, %v517_v6 }
 0x155   : > { %v632_v15 = vadd.f32 %v613_v13, %v574_v9  ;;  %v633_v16 = vadd.f32 %v627_v14, %v575_v10 }
 0x15a   : > { %v669_v3 = vpop.f32.mrf.mxu0  ;;  %v683_v4 = vpop.f32.mrf.mxu1 }
 0x15b   : > { %v688_v7 = vadd.f32 %v669_v3, %v630_v0  ;;  %v689_v8 = vadd.f32 %v683_v4, %v631_v1 }
 0x15d   : > { %v704_v11 = vadd.f32 %v697_v2, %v688_v7  ;;  %v705_v12 = vadd.f32 %v697_v2, %v689_v8 }
 0x15f   : > { %708 = vst [vmem:[%s163_s26] sm:$0xff] %v704_v11 }
 0x160   : > { %709 = vst [vmem:[%s163_s26 + $0x8] sm:$0xff] %v705_v12 }
 0x162   : > { %v671_v18 = vpop.f32.mrf.mxu0  ;;  %v685_v19 = vpop.f32.mrf.mxu1 }
 0x163   : > { %v690_v20 = vadd.f32 %v671_v18, %v632_v15  ;;  %v691_v21 = vadd.f32 %v685_v19, %v633_v16 }
 0x165   : > { %v706_v22 = vadd.f32 %v702_v17, %v690_v20  ;;  %v707_v23 = vadd.f32 %v702_v17, %v691_v21 }
 0x167   : > { %710 = vst [vmem:[%s163_s26 + $0x10] sm:$0xff] %v706_v22 }
 0x168   : > { %711 = vst [vmem:[%s163_s26 + $0x18] sm:$0xff] %v707_v23 }
 0x169   : > { %961 = shalt.err (!%p958_p3)
}
 0x16a   : > { %s1007_s17 = smov 256   ;;  %s1008_s19 = smov 16  }
 0x16b   : > { %882 = dma.vmem_to_hbm [thread:$0]  (%p1067_p5), %s726_s30, 512, %s728_s16, %s713_s4, %s1007_s17, %s1007_s17, %s1008_s19  }
 0x16c PF: > { %p888_p4 = scmp.ge.s32.totalorder %s996_s15, 2  ;;  %s742_s20 = sand.u32 1, %s984_s12  }
 0x16d   : > { %s743_s24 = scalar_lea.sflag [#allocation3], %s742_s20 }
 0x16e   : > { %p885_p7 = pnand %p888_p4, %p1071_p6 }
 0x170   : > { %p886_p8 = pneg %p885_p7 }
 0x172   : > { %979 = dma.done.wait (%p886_p8), %s743_s24, 512  }
 0x173   : > { %981 = vsyncadd (%p886_p8), %s743_s24, 4294966784  ;;  %p13_p9 = scmp.ge.s32.totalorder %s1054_s18, 4   ;;  %s1193_s12 = smov %s988_s13 }
 0x174   : > { %s1194_s13 = smov %s992_s14  ;;  %s1195_s14 = smov %s1065_s21 }
 0x175   : > { %s1196_s15 = smov %s1054_s18  ;;  %15 = sbr.rel (!%p13_p9) target bundleno = 3 (0x3), region = 75 }
 0x17a   :  { %749 = vsyncpa [#allocation3], 1 }
 0x17b   :  { %751 = vsyncpa [#allocation3 + $0x1], 1 }

</bundles_post_ra>
